<compile_context>
chip_gen: v7x
topology: tpu7x:2x2x1
jax: 0.10.0
libtpu: 0.0.40
codegen_flags: <defaults>
</compile_context>

<pallas_src>
import functools

import jax
import jax.numpy as jnp
from jax.experimental import pallas as pl
from jax.experimental.pallas import tpu as pltpu

IN_DIM = 1 * 28 * 28   # 784
HID = 100
OUT_DIM = 10

# Lane-dense (128-lane vreg width) padded feature dims used inside the kernel.
HID_P = 128
OUT_P = 128


def _mlp_kernel(x_ref, w1_ref, b1_ref, w2_ref, b2_ref, w3_ref, b3_ref, o_ref):
    # x_ref: (bm, 784) batch tile in its HBM dtype (f32).  Cast to the matmul
    # dtype here (VPU cast in VMEM, hidden under the DMA) rather than in the
    # wrapper.  Weights are stored (in, out): y = x @ W + b == torch's x @ W.T + b.
    x = x_ref[...].astype(w1_ref.dtype)

    # fc1 + ReLU  (MXU matmul, f32 accumulation; bias/ReLU in f32 on the VPU)
    h = jnp.dot(x, w1_ref[...], preferred_element_type=jnp.float32)
    h = jnp.maximum(h + b1_ref[...], 0.0)

    # fc2 + ReLU
    h = jnp.dot(h.astype(w2_ref.dtype), w2_ref[...],
                preferred_element_type=jnp.float32)
    h = jnp.maximum(h + b2_ref[...], 0.0)

    # fc3 (logits) — padded output columns are exactly zero (zero w3/b3 pads).
    out = jnp.dot(h.astype(w3_ref.dtype), w3_ref[...],
                  preferred_element_type=jnp.float32)
    o_ref[...] = (out + b3_ref[...]).astype(o_ref.dtype)


def _round_up(n, m):
    return ((n + m - 1) // m) * m


def _pad_to(a, shape):
    return jnp.pad(a, [(0, t - s) for s, t in zip(a.shape, shape)])


@functools.partial(jax.jit, static_argnames=("block_m", "use_bf16"))
def mnist_fcl_forward(x_nchw, params, block_m=512, use_bf16=True):
    """Forward pass of mnist_FCL.

    x_nchw : (B, 1, 28, 28) float32
    params : dict  w1 (784,100) b1 (1,100) w2 (100,100) b2 (1,100)
                   w3 (100,10)  b3 (1,10)
    returns: (B, 10) float32 logits
    """
    B = x_nchw.shape[0]
    x = x_nchw.reshape(B, IN_DIM)                 # == torch.flatten(x, 1)

    # MXU-sized batch tile; shrink for small batches, pad B to a tile multiple.
    bm = min(block_m, _round_up(B, 8))
    Bp = _round_up(B, bm)
    if Bp != B:
        x = jnp.pad(x, ((0, Bp - B), (0, 0)))

    # Zero-pad feature dims to 128 lanes (lane-dense epilogues + output store).
    # Weights are tiny (~0.4 MB total) so this wrapper-side prep is negligible.
    w1 = _pad_to(params["w1"], (IN_DIM, HID_P))
    b1 = _pad_to(params["b1"], (1, HID_P))
    w2 = _pad_to(params["w2"], (HID_P, HID_P))
    b2 = _pad_to(params["b2"], (1, HID_P))
    w3 = _pad_to(params["w3"], (HID_P, OUT_P))
    b3 = _pad_to(params["b3"], (1, OUT_P))

    if use_bf16:
        # bf16 matmul operands (weights streamed once, x cast inside the kernel),
        # f32 accumulation.  Biases stay f32.
        w1 = w1.astype(jnp.bfloat16)
        w2 = w2.astype(jnp.bfloat16)
        w3 = w3.astype(jnp.bfloat16)

    grid = (Bp // bm,)

    def full(arr):   # whole (small) tensor resident in VMEM every step
        return pl.BlockSpec(arr.shape, lambda i: (0, 0))

    out = pl.pallas_call(
        _mlp_kernel,
        out_shape=jax.ShapeDtypeStruct((Bp, OUT_P), jnp.float32),
        grid=grid,
        in_specs=[
            pl.BlockSpec((bm, IN_DIM), lambda i: (i, 0)),   # x batch tile
            full(w1), full(b1),
            full(w2), full(b2),
            full(w3), full(b3),
        ],
        out_specs=pl.BlockSpec((bm, OUT_P), lambda i: (i, 0)),
        compiler_params=pltpu.CompilerParams(
            dimension_semantics=("parallel",),
        ),
    )(x, w1, b1, w2, b2, w3, b3)

    return out[:B, :OUT_DIM]


def init_params(key):
    """nn.Linear default init: U(-1/sqrt(fan_in), +1/sqrt(fan_in)); weights (in, out)."""
    dims = [(IN_DIM, HID), (HID, HID), (HID, OUT_DIM)]
    params = {}
    for idx, (fan_in, fan_out) in enumerate(dims, start=1):
        key, kw, kb = jax.random.split(key, 3)
        bound = 1.0 / jnp.sqrt(float(fan_in))
        params[f"w{idx}"] = jax.random.uniform(
            kw, (fan_in, fan_out), jnp.float32, -bound, bound)
        params[f"b{idx}"] = jax.random.uniform(
            kb, (1, fan_out), jnp.float32, -bound, bound)
    return params


def _reference_forward(x_nchw, params):
    """Plain-JAX f32 reference (matches the PyTorch module)."""
    x = x_nchw.reshape(x_nchw.shape[0], IN_DIM)
    h = jnp.maximum(x @ params["w1"] + params["b1"], 0.0)
    h = jnp.maximum(h @ params["w2"] + params["b2"], 0.0)
    return h @ params["w3"] + params["b3"]


if __name__ == "__main__":
    key = jax.random.PRNGKey(0)
    key, kx = jax.random.split(key)

    B = 8  # small test batch; wrapper handles any B (pads to the tile size)
    x = jax.random.normal(kx, (B, 1, 28, 28), jnp.float32)  # NCHW like torch
    params = init_params(key)

    ref = _reference_forward(x, params)

    # Exact f32 path.
    out_f32 = jax.block_until_ready(mnist_fcl_forward(x, params, use_bf16=False))
    assert out_f32.shape == (B, OUT_DIM)
    assert jnp.allclose(out_f32, ref, atol=1e-4, rtol=1e-4), "f32 mismatch vs reference"

    # Default fast path (bf16 matmul operands, f32 accumulate / epilogue).
    out = jax.block_until_ready(mnist_fcl_forward(x, params))
    assert out.shape == (B, OUT_DIM)
    assert jnp.allclose(out, ref, atol=5e-2, rtol=5e-2), "bf16 mismatch vs reference"

    print("KERNEL_OK")
</pallas_src>

<mosaic_0001>
module attributes {stable_mosaic.version = 11 : i64} {
  func.func @_mlp_kernel(%arg0: i32, %arg1: memref<8x784xf32, #tpu.memory_space<vmem>>, %arg2: memref<784x128xf32, #tpu.memory_space<vmem>>, %arg3: memref<1x128xf32, #tpu.memory_space<vmem>>, %arg4: memref<128x128xf32, #tpu.memory_space<vmem>>, %arg5: memref<1x128xf32, #tpu.memory_space<vmem>>, %arg6: memref<128x128xf32, #tpu.memory_space<vmem>>, %arg7: memref<1x128xf32, #tpu.memory_space<vmem>>, %arg8: memref<8x128xf32, #tpu.memory_space<vmem>>) attributes {dimension_semantics = [#tpu.dimension_semantics<parallel>], iteration_bounds = array<i64: 1>, scalar_prefetch = 0 : i64, scratch_operands = 0 : i64, tpu.core_type = #tpu.core_type<tc>, window_params = [{transform_indices = @transform_0, window_bounds = array<i64: 8, 784>}, {pipeline_mode = #tpu.pipeline_mode<synchronous>, transform_indices = @transform_1, window_bounds = array<i64: 784, 128>}, {pipeline_mode = #tpu.pipeline_mode<synchronous>, transform_indices = @transform_2, window_bounds = array<i64: 1, 128>}, {pipeline_mode = #tpu.pipeline_mode<synchronous>, transform_indices = @transform_3, window_bounds = array<i64: 128, 128>}, {pipeline_mode = #tpu.pipeline_mode<synchronous>, transform_indices = @transform_4, window_bounds = array<i64: 1, 128>}, {pipeline_mode = #tpu.pipeline_mode<synchronous>, transform_indices = @transform_5, window_bounds = array<i64: 128, 128>}, {pipeline_mode = #tpu.pipeline_mode<synchronous>, transform_indices = @transform_6, window_bounds = array<i64: 1, 128>}, {transform_indices = @transform_7, window_bounds = array<i64: 8, 128>}]} {
    %c0 = arith.constant 0 : index
    %c0_0 = arith.constant 0 : index
    %0 = vector.load %arg1[%c0, %c0_0] : memref<8x784xf32, #tpu.memory_space<vmem>>, vector<8x784xf32>
    %c0_1 = arith.constant 0 : index
    %c0_2 = arith.constant 0 : index
    %1 = vector.load %arg2[%c0_1, %c0_2] : memref<784x128xf32, #tpu.memory_space<vmem>>, vector<784x128xf32>
    %cst = arith.constant dense<0.000000e+00> : vector<8x128xf32>
    %2 = tpu.matmul %0, %1, %cst {dimension_numbers = #tpu.dot_dimension_numbers<[1], [0], [0], [1], [0, 0, 1, 1], [], []>} : vector<8x784xf32>, vector<784x128xf32>, vector<8x128xf32> -> vector<8x128xf32>
    %c0_3 = arith.constant 0 : index
    %c0_4 = arith.constant 0 : index
    %3 = vector.load %arg3[%c0_3, %c0_4] : memref<1x128xf32, #tpu.memory_space<vmem>>, vector<1x128xf32>
    %4 = vector.broadcast %3 : vector<1x128xf32> to vector<8x128xf32>
    %5 = arith.addf %2, %4 : vector<8x128xf32>
    %cst_5 = arith.constant 0.000000e+00 : f32
    %6 = vector.broadcast %cst_5 : f32 to vector<8x128xf32>
    %7 = arith.maximumf %5, %6 : vector<8x128xf32>
    %c0_6 = arith.constant 0 : index
    %c0_7 = arith.constant 0 : index
    %8 = vector.load %arg4[%c0_6, %c0_7] : memref<128x128xf32, #tpu.memory_space<vmem>>, vector<128x128xf32>
    %cst_8 = arith.constant dense<0.000000e+00> : vector<8x128xf32>
    %9 = tpu.matmul %7, %8, %cst_8 {dimension_numbers = #tpu.dot_dimension_numbers<[1], [0], [0], [1], [0, 0, 1, 1], [], []>} : vector<8x128xf32>, vector<128x128xf32>, vector<8x128xf32> -> vector<8x128xf32>
    %c0_9 = arith.constant 0 : index
    %c0_10 = arith.constant 0 : index
    %10 = vector.load %arg5[%c0_9, %c0_10] : memref<1x128xf32, #tpu.memory_space<vmem>>, vector<1x128xf32>
    %11 = vector.broadcast %10 : vector<1x128xf32> to vector<8x128xf32>
    %12 = arith.addf %9, %11 : vector<8x128xf32>
    %cst_11 = arith.constant 0.000000e+00 : f32
    %13 = vector.broadcast %cst_11 : f32 to vector<8x128xf32>
    %14 = arith.maximumf %12, %13 : vector<8x128xf32>
    %c0_12 = arith.constant 0 : index
    %c0_13 = arith.constant 0 : index
    %15 = vector.load %arg6[%c0_12, %c0_13] : memref<128x128xf32, #tpu.memory_space<vmem>>, vector<128x128xf32>
    %cst_14 = arith.constant dense<0.000000e+00> : vector<8x128xf32>
    %16 = tpu.matmul %14, %15, %cst_14 {dimension_numbers = #tpu.dot_dimension_numbers<[1], [0], [0], [1], [0, 0, 1, 1], [], []>} : vector<8x128xf32>, vector<128x128xf32>, vector<8x128xf32> -> vector<8x128xf32>
    %c0_15 = arith.constant 0 : index
    %c0_16 = arith.constant 0 : index
    %17 = vector.load %arg7[%c0_15, %c0_16] : memref<1x128xf32, #tpu.memory_space<vmem>>, vector<1x128xf32>
    %18 = vector.broadcast %17 : vector<1x128xf32> to vector<8x128xf32>
    %19 = arith.addf %16, %18 : vector<8x128xf32>
    %c0_17 = arith.constant 0 : index
    %c0_18 = arith.constant 0 : index
    %20 = vector.load %arg8[%c0_17, %c0_18] : memref<8x128xf32, #tpu.memory_space<vmem>>, vector<8x128xf32>
    tpu.vector_store %arg8[%c0_17, %c0_18], %19 {strides = array<i32>} : memref<8x128xf32, #tpu.memory_space<vmem>>, vector<8x128xf32>,
    return
  }
  func.func @transform_0(%arg0: i32) -> (i32, i32) {
    %c0_i32 = arith.constant 0 : i32
    %c0_i32_0 = arith.constant 0 : i32
    return %arg0, %c0_i32 : i32, i32
  }
  func.func @transform_1(%arg0: i32) -> (i32, i32) {
    %c0_i32 = arith.constant 0 : i32
    %c0_i32_0 = arith.constant 0 : i32
    %c0_i32_1 = arith.constant 0 : i32
    return %c0_i32, %c0_i32_0 : i32, i32
  }
  func.func @transform_2(%arg0: i32) -> (i32, i32) {
    %c0_i32 = arith.constant 0 : i32
    %c0_i32_0 = arith.constant 0 : i32
    %c0_i32_1 = arith.constant 0 : i32
    return %c0_i32, %c0_i32_0 : i32, i32
  }
  func.func @transform_3(%arg0: i32) -> (i32, i32) {
    %c0_i32 = arith.constant 0 : i32
    %c0_i32_0 = arith.constant 0 : i32
    %c0_i32_1 = arith.constant 0 : i32
    return %c0_i32, %c0_i32_0 : i32, i32
  }
  func.func @transform_4(%arg0: i32) -> (i32, i32) {
    %c0_i32 = arith.constant 0 : i32
    %c0_i32_0 = arith.constant 0 : i32
    %c0_i32_1 = arith.constant 0 : i32
    return %c0_i32, %c0_i32_0 : i32, i32
  }
  func.func @transform_5(%arg0: i32) -> (i32, i32) {
    %c0_i32 = arith.constant 0 : i32
    %c0_i32_0 = arith.constant 0 : i32
    %c0_i32_1 = arith.constant 0 : i32
    return %c0_i32, %c0_i32_0 : i32, i32
  }
  func.func @transform_6(%arg0: i32) -> (i32, i32) {
    %c0_i32 = arith.constant 0 : i32
    %c0_i32_0 = arith.constant 0 : i32
    %c0_i32_1 = arith.constant 0 : i32
    return %c0_i32, %c0_i32_0 : i32, i32
  }
  func.func @transform_7(%arg0: i32) -> (i32, i32) {
    %c0_i32 = arith.constant 0 : i32
    %c0_i32_0 = arith.constant 0 : i32
    return %arg0, %c0_i32 : i32, i32
  }
}

</mosaic_0001>

<bundles_post_ra>
// kernel: mnist_fcl_forward.1
= control target key start
LH: loop header
LB: loop body
LE: loop exit
PB: predicated region body
PF: predicated region fallthrough
CT: control target
= control target key end

     0   :  { %s1520_s0 = inlined_call_operand.vmem [shape: f32[8,784], index: 0, kind: input, shape index: {}]   ;;  %s1521_s1 = inlined_call_operand.vmem [shape: f32[784,128], index: 1, kind: input, shape index: {}]   ;;  %s1522_s2 = inlined_call_operand.vmem [shape: f32[1,128], index: 2, kind: input, shape index: {}]   ;;  %s1523_s3 = inlined_call_operand.vmem [shape: f32[128,128], index: 3, kind: input, shape index: {}]   ;;  %s1524_s4 = inlined_call_operand.vmem [shape: f32[1,128], index: 4, kind: input, shape index: {}]   ;;  %s1525_s5 = inlined_call_operand.vmem [shape: f32[128,128], index: 5, kind: input, shape index: {}]   ;;  %s1526_s6 = inlined_call_operand.vmem [shape: f32[1,128], index: 6, kind: input, shape index: {}]   ;;  %s1527_s7 = inlined_call_operand.hbm [shape: f32[8,128], index: 7, kind: output, shape index: {}]  }
   0x1   :  { %v50_v0 = vld [vmem:[%s1521_s1 + $0x80] sm:$0xff]  ;;  %v51_v1 = vld [vmem:[%s1521_s1 + $0x88] sm:$0xff]  ;;  %v52_v11 = vld [vmem:[%s1521_s1 + $0x90] sm:$0xff] }
   0x2   :  { %v34_v2 = vld [vmem:[%s1521_s1] sm:$0xff]  ;;  %v849_v3 = vpack.c.bf16 %v51_v1, %v50_v0  ;;  %v35_v4 = vld [vmem:[%s1521_s1 + $0x8] sm:$0xff]  ;;  %v53_v13 = vld [vmem:[%s1521_s1 + $0x98] sm:$0xff] }
   0x3   :  { %v82_v5 = vld [vmem:[%s1521_s1 + $0x180] sm:$0xff]  ;;  %v83_v6 = vld [vmem:[%s1521_s1 + $0x188] sm:$0xff]  ;;  %v851_v7 = vpack.c.bf16 %v35_v4, %v34_v2  ;;  %v36_v14 = vld [vmem:[%s1521_s1 + $0x10] sm:$0xff]  ;;  %v853_v16 = vpack.c.bf16 %v53_v13, %v52_v11 }
   0x4   :  { %v881_v8 = vpack.c.bf16 %v83_v6, %v82_v5  ;;  %v66_v9 = vld [vmem:[%s1521_s1 + $0x100] sm:$0xff]  ;;  %v67_v10 = vld [vmem:[%s1521_s1 + $0x108] sm:$0xff]  ;;  %850 = vmatprep.subr.bf16.mxu0 %v849_v3  ;;  %v37_v15 = vld [vmem:[%s1521_s1 + $0x18] sm:$0xff] }
   0x5   :  { %v883_v12 = vpack.c.bf16 %v67_v10, %v66_v9  ;;  %852 = vmatpush3.bf16.msra.mxu0 %v851_v7  ;;  %v855_v17 = vpack.c.bf16 %v37_v15, %v36_v14  ;;  %v84_v18 = vld [vmem:[%s1521_s1 + $0x190] sm:$0xff]  ;;  %v85_v19 = vld [vmem:[%s1521_s1 + $0x198] sm:$0xff]  ;;  %v54_v23 = vld [vmem:[%s1521_s1 + $0xa0] sm:$0xff] }
   0x6   :  { %882 = vmatprep.subr.bf16.mxu1 %v881_v8  ;;  %v68_v20 = vld [vmem:[%s1521_s1 + $0x110] sm:$0xff]  ;;  %v885_v21 = vpack.c.bf16 %v85_v19, %v84_v18  ;;  %v69_v22 = vld [vmem:[%s1521_s1 + $0x118] sm:$0xff]  ;;  %v55_v24 = vld [vmem:[%s1521_s1 + $0xa8] sm:$0xff]  ;;  %854 = vmatprep.subr.bf16.mxu0 %v853_v16 }
   0x7   :  { %884 = vmatpush3.bf16.msra.mxu1 %v883_v12  ;;  %v887_v25 = vpack.c.bf16 %v69_v22, %v68_v20  ;;  %v857_v26 = vpack.c.bf16 %v55_v24, %v54_v23  ;;  %v38_v27 = vld [vmem:[%s1521_s1 + $0x20] sm:$0xff]  ;;  %v39_v28 = vld [vmem:[%s1521_s1 + $0x28] sm:$0xff]  ;;  %v56_v35 = vld [vmem:[%s1521_s1 + $0xb0] sm:$0xff] }
   0x8   :  { %v86_v29 = vld [vmem:[%s1521_s1 + $0x1a0] sm:$0xff]  ;;  %886 = vmatprep.subr.bf16.mxu1 %v885_v21  ;;  %v87_v30 = vld [vmem:[%s1521_s1 + $0x1a8] sm:$0xff]  ;;  %v859_v33 = vpack.c.bf16 %v39_v28, %v38_v27  ;;  %v57_v36 = vld [vmem:[%s1521_s1 + $0xb8] sm:$0xff] }
   0x9   :  { %v70_v31 = vld [vmem:[%s1521_s1 + $0x120] sm:$0xff]  ;;  %v71_v32 = vld [vmem:[%s1521_s1 + $0x128] sm:$0xff]  ;;  %856 = vmatpush3.bf16.msra.mxu0 %v855_v17  ;;  %v889_v34 = vpack.c.bf16 %v87_v30, %v86_v29  ;;  %v40_v37 = vld [vmem:[%s1521_s1 + $0x30] sm:$0xff]  ;;  %v861_v39 = vpack.c.bf16 %v57_v36, %v56_v35 }
   0xa   :  { %858 = vmatprep.subr.bf16.mxu0 %v857_v26  ;;  %v891_v38 = vpack.c.bf16 %v71_v32, %v70_v31  ;;  %v41_v40 = vld [vmem:[%s1521_s1 + $0x38] sm:$0xff]  ;;  %v88_v41 = vld [vmem:[%s1521_s1 + $0x1b0] sm:$0xff]  ;;  %v58_v46 = vld [vmem:[%s1521_s1 + $0xc0] sm:$0xff] }
   0xb   :  { %888 = vmatpush3.bf16.msra.mxu1 %v887_v25  ;;  %v89_v42 = vld [vmem:[%s1521_s1 + $0x1b8] sm:$0xff]  ;;  %v72_v44 = vld [vmem:[%s1521_s1 + $0x130] sm:$0xff]  ;;  %v59_v47 = vld [vmem:[%s1521_s1 + $0xc8] sm:$0xff]  ;;  %v863_v48 = vpack.c.bf16 %v41_v40, %v40_v37 }
   0xc   :  { %890 = vmatprep.subr.bf16.mxu1 %v889_v34  ;;  %v893_v43 = vpack.c.bf16 %v89_v42, %v88_v41  ;;  %v73_v45 = vld [vmem:[%s1521_s1 + $0x138] sm:$0xff]  ;;  %v90_v49 = vld [vmem:[%s1521_s1 + $0x1c0] sm:$0xff]  ;;  %v91_v50 = vld [vmem:[%s1521_s1 + $0x1c8] sm:$0xff]  ;;  %v865_v52 = vpack.c.bf16 %v59_v47, %v58_v46 }
   0xd   :  { %860 = vmatpush3.bf16.msra.mxu0 %v859_v33  ;;  %v895_v51 = vpack.c.bf16 %v73_v45, %v72_v44  ;;  %v42_v53 = vld [vmem:[%s1521_s1 + $0x40] sm:$0xff]  ;;  %v43_v54 = vld [vmem:[%s1521_s1 + $0x48] sm:$0xff]  ;;  %v897_v56 = vpack.c.bf16 %v91_v50, %v90_v49  ;;  %v60_v58 = vld [vmem:[%s1521_s1 + $0xd0] sm:$0xff]  ;;  %v1024_v50 = vmov 0.0|0.0  }
   0xe   :  { %862 = vmatprep.subr.bf16.mxu0 %v861_v39  ;;  %v74_v55 = vld [vmem:[%s1521_s1 + $0x140] sm:$0xff]  ;;  %v75_v57 = vld [vmem:[%s1521_s1 + $0x148] sm:$0xff]  ;;  %v61_v59 = vld [vmem:[%s1521_s1 + $0xd8] sm:$0xff]  ;;  %v867_v62 = vpack.c.bf16 %v43_v54, %v42_v53 }
   0xf   :  { %892 = vmatpush3.bf16.msra.mxu1 %v891_v38  ;;  %v92_v60 = vld [vmem:[%s1521_s1 + $0x1d0] sm:$0xff]  ;;  %v93_v61 = vld [vmem:[%s1521_s1 + $0x1d8] sm:$0xff]  ;;  %v899_v63 = vpack.c.bf16 %v75_v57, %v74_v55  ;;  %v869_v0 = vpack.c.bf16 %v61_v59, %v60_v58  ;;  %v62_v6 = vld [vmem:[%s1521_s1 + $0xe0] sm:$0xff] }
  0x10   :  { %894 = vmatprep.subr.bf16.mxu1 %v893_v43  ;;  %v44_v1 = vld [vmem:[%s1521_s1 + $0x50] sm:$0xff]  ;;  %v45_v2 = vld [vmem:[%s1521_s1 + $0x58] sm:$0xff]  ;;  %v901_v4 = vpack.c.bf16 %v93_v61, %v92_v60  ;;  %v63_v7 = vld [vmem:[%s1521_s1 + $0xe8] sm:$0xff] }
  0x11   :  { %864 = vmatpush3.bf16.msra.mxu0 %v863_v48  ;;  %v76_v3 = vld [vmem:[%s1521_s1 + $0x150] sm:$0xff]  ;;  %v77_v5 = vld [vmem:[%s1521_s1 + $0x158] sm:$0xff]  ;;  %v94_v8 = vld [vmem:[%s1521_s1 + $0x1e0] sm:$0xff]  ;;  %v871_v10 = vpack.c.bf16 %v45_v2, %v44_v1  ;;  %v873_v14 = vpack.c.bf16 %v63_v7, %v62_v6 }
  0x12   :  { %866 = vmatprep.subr.bf16.mxu0 %v865_v52  ;;  %v95_v9 = vld [vmem:[%s1521_s1 + $0x1e8] sm:$0xff]  ;;  %v46_v11 = vld [vmem:[%s1521_s1 + $0x60] sm:$0xff]  ;;  %v903_v13 = vpack.c.bf16 %v77_v5, %v76_v3  ;;  %v64_v19 = vld [vmem:[%s1521_s1 + $0xf0] sm:$0xff] }
  0x13   :  { %896 = vmatpush3.bf16.msra.mxu1 %v895_v51  ;;  %v28_v12 = vld [vmem:[%s1520_s0 + $0x8] sm:$0xff]  ;;  %v78_v16 = vld [vmem:[%s1521_s1 + $0x160] sm:$0xff]  ;;  %v905_v18 = vpack.c.bf16 %v95_v9, %v94_v8  ;;  %v65_v20 = vld [vmem:[%s1521_s1 + $0xf8] sm:$0xff] }
  0x14   :  { %898 = vmatprep.subr.bf16.mxu1 %v897_v56  ;;  %v47_v15 = vld [vmem:[%s1521_s1 + $0x68] sm:$0xff]  ;;  %207 = vmatprep.mubr.f32.mxu0 %v28_v12  ;;  %v30_v21 = vld [vmem:[%s1520_s0 + $0x18] sm:$0xff]  ;;  %v96_v22 = vld [vmem:[%s1521_s1 + $0x1f0] sm:$0xff]  ;;  %v877_v26 = vpack.c.bf16 %v65_v20, %v64_v19 }
  0x15   :  { %868 = vmatpush3.bf16.msra.mxu0 %v867_v62  ;;  %v79_v17 = vld [vmem:[%s1521_s1 + $0x168] sm:$0xff]  ;;  %v97_v23 = vld [vmem:[%s1521_s1 + $0x1f8] sm:$0xff]  ;;  %277 = vmatprep.mubr.f32.mxu1 %v30_v21  ;;  %v875_v24 = vpack.c.bf16 %v47_v15, %v46_v11  ;;  %v48_v27 = vld [vmem:[%s1521_s1 + $0x70] sm:$0xff] }
  0x16   :  { %870 = vmatprep.subr.bf16.mxu0 %v869_v0  ;;  %v907_v25 = vpack.c.bf16 %v79_v17, %v78_v16  ;;  %v49_v28 = vld [vmem:[%s1521_s1 + $0x78] sm:$0xff]  ;;  %v80_v29 = vld [vmem:[%s1521_s1 + $0x170] sm:$0xff]  ;;  %v909_v30 = vpack.c.bf16 %v97_v23, %v96_v22  ;;  %v114_v32 = vld [vmem:[%s1521_s1 + $0x280] sm:$0xff] }
  0x17   :  { %900 = vmatpush3.bf16.msra.mxu1 %v899_v63  ;;  %v81_v31 = vld [vmem:[%s1521_s1 + $0x178] sm:$0xff]  ;;  %v115_v33 = vld [vmem:[%s1521_s1 + $0x288] sm:$0xff]  ;;  %v879_v34 = vpack.c.bf16 %v49_v28, %v48_v27  ;;  %v98_v37 = vld [vmem:[%s1521_s1 + $0x200] sm:$0xff] }
  0x18   :  { %902 = vmatprep.subr.bf16.mxu1 %v901_v4  ;;  %v911_v35 = vpack.c.bf16 %v81_v31, %v80_v29  ;;  %v913_v36 = vpack.c.bf16 %v115_v33, %v114_v32  ;;  %v99_v38 = vld [vmem:[%s1521_s1 + $0x208] sm:$0xff]  ;;  %v116_v39 = vld [vmem:[%s1521_s1 + $0x290] sm:$0xff]  ;;  %v117_v40 = vld [vmem:[%s1521_s1 + $0x298] sm:$0xff] }
  0x19   :  { %872 = vmatpush3.bf16.msra.mxu0 %v871_v10  ;;  %v27_v41 = vld [vmem:[%s1520_s0] sm:$0xff]  ;;  %v915_v42 = vpack.c.bf16 %v99_v38, %v98_v37  ;;  %v29_v43 = vld [vmem:[%s1520_s0 + $0x10] sm:$0xff]  ;;  %v917_v45 = vpack.c.bf16 %v117_v40, %v116_v39  ;;  %v101_v46 = vld [vmem:[%s1521_s1 + $0x218] sm:$0xff] }
  0x1a   :  { %874 = vmatprep.subr.bf16.mxu0 %v873_v14  ;;  %v100_v44 = vld [vmem:[%s1521_s1 + $0x210] sm:$0xff]  ;;  %v118_v47 = vld [vmem:[%s1521_s1 + $0x2a0] sm:$0xff]  ;;  %v119_v48 = vld [vmem:[%s1521_s1 + $0x2a8] sm:$0xff] }
  0x1b   :  { %904 = vmatpush3.bf16.msra.mxu1 %v903_v13  ;;  %v32_v49 = vld [vmem:[%s1520_s0 + $0x28] sm:$0xff]  ;;  %v130_v51 = vld [vmem:[%s1521_s1 + $0x300] sm:$0xff] }
  0x1c   :  { %906 = vmatprep.subr.bf16.mxu1 %v905_v18  ;;  %v131_v52 = vld [vmem:[%s1521_s1 + $0x308] sm:$0xff] }
  0x1d   :  { %876 = vmatpush3.bf16.msra.mxu0 %v875_v24  ;;  %v946_v53 = vpack.c.bf16 %v131_v52, %v130_v51 }
  0x1e   :  { %878 = vmatprep.subr.bf16.mxu0 %v877_v26 }
  0x1f   :  { %908 = vmatpush3.bf16.msra.mxu1 %v907_v25 }
  0x20   :  { %910 = vmatprep.subr.bf16.mxu1 %v909_v30 }
  0x21   :  { %880 = vmatpush3.bf16.msra.mxu0 %v879_v34 }
  0x22   :  { %914 = vmatprep.subr.bf16.mxu0 %v913_v36 }
  0x23   :  { %912 = vmatpush3.bf16.msra.mxu1 %v911_v35 }
  0x24   :  { %945 = vmatprep.subr.bf16.mxu1 %v1024_v50  ;;  %208 = vmatmul.mubr.f32.vlgmr.msra.gmra.mrb[0].mxu0 %v27_v41 }
  0x25   :  { %12 = vsyncpa [#allocation3], 0  ;;  %916 = vmatpush3.bf16.msra.mxu0 %v915_v42  ;;  %v919_v54 = vpack.c.bf16 %v101_v46, %v100_v44  ;;  %v921_v55 = vpack.c.bf16 %v119_v48, %v118_v47  ;;  %v102_v56 = vld [vmem:[%s1521_s1 + $0x220] sm:$0xff]  ;;  %v103_v57 = vld [vmem:[%s1521_s1 + $0x228] sm:$0xff]  ;;  %347 = vmatprep.mubr.f32.mxu0 %v32_v49  ;;  %vm1025_vm0 = vmmov 0   ;;  %v1026_v60 = vmov 0.0  }
  0x26   :  { %278 = vmatmul.mubr.f32.vlgmr.msra.gmra.mrb[0].mxu1 %v29_v43  ;;  %918 = vmatprep.subr.bf16.mxu0 %v917_v45  ;;  %v120_v58 = vld [vmem:[%s1521_s1 + $0x2b0] sm:$0xff]  ;;  %v121_v59 = vld [vmem:[%s1521_s1 + $0x2b8] sm:$0xff]  ;;  %vm139_vm1 = vcmask 130048   ;;  %v923_v62 = vpack.c.bf16 %v103_v57, %v102_v56  ;;  %v122_v2 = vld [vmem:[%s1521_s1 + $0x2c0] sm:$0xff]  ;;  %s1027_s19 = smov [#allocation2]  }
  0x27   :  { %947 = vmatpush3.bf16.msra.mxu1 %v946_v53  ;;  %776 = vmatprep.mubr.msk.f32.mxu1 %vm1025_vm0, %v1026_v60  ;;  %v33_v61 = vld [vmem:[%s1520_s0 + $0x30] sm:$0xff]  ;;  %v925_v63 = vpack.c.bf16 %v121_v59, %v120_v58  ;;  %v105_v1 = vld [vmem:[%s1521_s1 + $0x238] sm:$0xff]  ;;  %v123_v3 = vld [vmem:[%s1521_s1 + $0x2c8] sm:$0xff]  ;;  %s618_s20 = sshll.u32 %s1027_s19, 4  ;;  %s619_s20 = int_to_ptr.vmem [resolvable:$true] %s618_s20 }
  0x28   :  { %948 = vmatprep.subr.bf16.mxu1 %v1024_v50  ;;  %v104_v0 = vld [vmem:[%s1521_s1 + $0x230] sm:$0xff]  ;;  %v929_v5 = vpack.c.bf16 %v123_v3, %v122_v2  ;;  %v106_v6 = vld [vmem:[%s1521_s1 + $0x240] sm:$0xff]  ;;  %v107_v7 = vld [vmem:[%s1521_s1 + $0x248] sm:$0xff]  ;;  %p1005_p1 = scmp.lt.s32.totalorder %s619_s20, %s619_s20 }
  0x29   :  { %920 = vmatpush3.bf16.msra.mxu0 %v919_v54  ;;  %v927_v4 = vpack.c.bf16 %v105_v1, %v104_v0  ;;  %v124_v8 = vld [vmem:[%s1521_s1 + $0x2d0] sm:$0xff]  ;;  %v125_v9 = vld [vmem:[%s1521_s1 + $0x2d8] sm:$0xff]  ;;  %v931_v10 = vpack.c.bf16 %v107_v7, %v106_v6  ;;  %v126_v14 = vld [vmem:[%s1521_s1 + $0x2e0] sm:$0xff] }
  0x2a   :  { %922 = vmatprep.subr.bf16.mxu0 %v921_v55  ;;  %777 = vmatmul.mubr.msk.f32.vlgmr.msra.gmra.mrb[2].mxu1 %vm139_vm1, %v33_v61  ;;  %v933_v11 = vpack.c.bf16 %v125_v9, %v124_v8  ;;  %v108_v12 = vld [vmem:[%s1521_s1 + $0x250] sm:$0xff]  ;;  %v109_v13 = vld [vmem:[%s1521_s1 + $0x258] sm:$0xff]  ;;  %v127_v15 = vld [vmem:[%s1521_s1 + $0x2e8] sm:$0xff] }
  0x2b   :  { %811 = vmatprep.mubr.msk.f32.mxu1 %vm1025_vm0, %v1026_v60  ;;  %v935_v16 = vpack.c.bf16 %v109_v13, %v108_v12  ;;  %v937_v17 = vpack.c.bf16 %v127_v15, %v126_v14  ;;  %v110_v18 = vld [vmem:[%s1521_s1 + $0x260] sm:$0xff]  ;;  %v111_v19 = vld [vmem:[%s1521_s1 + $0x268] sm:$0xff]  ;;  %v128_v20 = vld [vmem:[%s1521_s1 + $0x2f0] sm:$0xff] }
  0x2c   :  { %v129_v21 = vld [vmem:[%s1521_s1 + $0x2f8] sm:$0xff]  ;;  %v939_v22 = vpack.c.bf16 %v111_v19, %v110_v18  ;;  %v112_v24 = vld [vmem:[%s1521_s1 + $0x270] sm:$0xff]  ;;  %v31_v27 = vld [vmem:[%s1520_s0 + $0x20] sm:$0xff] }
  0x2d   :  { %924 = vmatpush3.bf16.msra.mxu0 %v923_v62  ;;  %v941_v23 = vpack.c.bf16 %v129_v21, %v128_v20  ;;  %v113_v25 = vld [vmem:[%s1521_s1 + $0x278] sm:$0xff]  ;;  %v424_v28 = vld [vmem:[%s1523_s3] sm:$0xff]  ;;  %v425_v29 = vld [vmem:[%s1523_s3 + $0x8] sm:$0xff] }
  0x2e   :  { %926 = vmatprep.subr.bf16.mxu0 %v925_v63  ;;  %v943_v26 = vpack.c.bf16 %v113_v25, %v112_v24  ;;  %v426_v30 = vld [vmem:[%s1523_s3 + $0x10] sm:$0xff]  ;;  %v949_v31 = vpack.c.bf16 %v425_v29, %v424_v28  ;;  %v427_v32 = vld [vmem:[%s1523_s3 + $0x18] sm:$0xff]  ;;  %v428_v34 = vld [vmem:[%s1523_s3 + $0x20] sm:$0xff] }
  0x2f   :  { %v952_v33 = vpack.c.bf16 %v427_v32, %v426_v30  ;;  %v429_v35 = vld [vmem:[%s1523_s3 + $0x28] sm:$0xff]  ;;  %v430_v37 = vld [vmem:[%s1523_s3 + $0x30] sm:$0xff]  ;;  %v431_v38 = vld [vmem:[%s1523_s3 + $0x38] sm:$0xff] }
  0x30   :  { %950 = vmatpush3.bf16.msra.mxu1 %v949_v31  ;;  %v955_v36 = vpack.c.bf16 %v429_v35, %v428_v34  ;;  %v958_v39 = vpack.c.bf16 %v431_v38, %v430_v37  ;;  %v432_v40 = vld [vmem:[%s1523_s3 + $0x40] sm:$0xff]  ;;  %v433_v41 = vld [vmem:[%s1523_s3 + $0x48] sm:$0xff]  ;;  %v434_v43 = vld [vmem:[%s1523_s3 + $0x50] sm:$0xff] }
  0x31   :  { %928 = vmatpush3.bf16.msra.mxu0 %v927_v4  ;;  %951 = vmatprep.subr.bf16.mxu1 %v1024_v50  ;;  %v961_v42 = vpack.c.bf16 %v433_v41, %v432_v40  ;;  %v435_v44 = vld [vmem:[%s1523_s3 + $0x58] sm:$0xff]  ;;  %v436_v46 = vld [vmem:[%s1523_s3 + $0x60] sm:$0xff]  ;;  %v437_v47 = vld [vmem:[%s1523_s3 + $0x68] sm:$0xff] }
  0x32   :  { %930 = vmatprep.subr.bf16.mxu0 %v929_v5  ;;  %v964_v45 = vpack.c.bf16 %v435_v44, %v434_v43  ;;  %v967_v48 = vpack.c.bf16 %v437_v47, %v436_v46  ;;  %v438_v49 = vld [vmem:[%s1523_s3 + $0x70] sm:$0xff]  ;;  %v439_v51 = vld [vmem:[%s1523_s3 + $0x78] sm:$0xff]  ;;  %v518_v53 = vld [vmem:[%s1525_s5] sm:$0xff] }
  0x33   :  { %v970_v52 = vpack.c.bf16 %v439_v51, %v438_v49  ;;  %v519_v54 = vld [vmem:[%s1525_s5 + $0x8] sm:$0xff]  ;;  %v520_v55 = vld [vmem:[%s1525_s5 + $0x10] sm:$0xff]  ;;  %v521_v57 = vld [vmem:[%s1525_s5 + $0x18] sm:$0xff] }
  0x34   :  { %953 = vmatpush3.bf16.msra.mxu1 %v952_v33  ;;  %v973_v56 = vpack.c.bf16 %v519_v54, %v518_v53  ;;  %v976_v58 = vpack.c.bf16 %v521_v57, %v520_v55  ;;  %v522_v59 = vld [vmem:[%s1525_s5 + $0x20] sm:$0xff]  ;;  %v524_v62 = vld [vmem:[%s1525_s5 + $0x30] sm:$0xff]  ;;  %v525_v63 = vld [vmem:[%s1525_s5 + $0x38] sm:$0xff] }
  0x35   :  { %932 = vmatpush3.bf16.msra.mxu0 %v931_v10  ;;  %954 = vmatprep.subr.bf16.mxu1 %v1024_v50  ;;  %v982_v0 = vpack.c.bf16 %v525_v63, %v524_v62  ;;  %v526_v1 = vld [vmem:[%s1525_s5 + $0x40] sm:$0xff]  ;;  %v527_v2 = vld [vmem:[%s1525_s5 + $0x48] sm:$0xff]  ;;  %v528_v4 = vld [vmem:[%s1525_s5 + $0x50] sm:$0xff] }
  0x36   :  { %934 = vmatprep.subr.bf16.mxu0 %v933_v11  ;;  %v985_v3 = vpack.c.bf16 %v527_v2, %v526_v1  ;;  %v529_v5 = vld [vmem:[%s1525_s5 + $0x58] sm:$0xff]  ;;  %v530_v7 = vld [vmem:[%s1525_s5 + $0x60] sm:$0xff]  ;;  %v531_v8 = vld [vmem:[%s1525_s5 + $0x68] sm:$0xff] }
  0x37   :  { %v988_v6 = vpack.c.bf16 %v529_v5, %v528_v4  ;;  %v991_v9 = vpack.c.bf16 %v531_v8, %v530_v7  ;;  %v626_v11 = vld [vmem:[%s1522_s2] ss:$0 sm:$0xff] }
  0x38   :  { %956 = vmatpush3.bf16.msra.mxu1 %v955_v36  ;;  %v628_v29 = vld [vmem:[%s1524_s4] ss:$0 sm:$0xff] }
  0x39   :  { %936 = vmatpush3.bf16.msra.mxu0 %v935_v16  ;;  %957 = vmatprep.subr.bf16.mxu1 %v1024_v50  ;;  %v629_v34 = vld [vmem:[%s1526_s6] ss:$0 sm:$0xff] }
  0x3a   :  { %938 = vmatprep.subr.bf16.mxu0 %v937_v17 }
  0x3c   :  { %959 = vmatpush3.bf16.msra.mxu1 %v958_v39 }
  0x3d   :  { %940 = vmatpush3.bf16.msra.mxu0 %v939_v22  ;;  %960 = vmatprep.subr.bf16.mxu1 %v1024_v50 }
  0x3e   :  { %942 = vmatprep.subr.bf16.mxu0 %v941_v23 }
  0x40   :  { %962 = vmatpush3.bf16.msra.mxu1 %v961_v42 }
  0x41   :  { %944 = vmatpush3.bf16.msra.mxu0 %v943_v26  ;;  %963 = vmatprep.subr.bf16.mxu1 %v1024_v50  ;;  %v532_v26 = vld [vmem:[%s1525_s5 + $0x70] sm:$0xff] }
  0x42   :  { %972 = vmatprep.subr.bf16.mxu0 %v1024_v50 }
  0x44   :  { %348 = vmatmul.mubr.f32.vlgmr.msra.gmra.mrb[2].mxu0 %v31_v27  ;;  %965 = vmatpush3.bf16.msra.mxu1 %v964_v45  ;;  %v533_v27 = vld [vmem:[%s1525_s5 + $0x78] sm:$0xff] }
  0x45   :  { %846 = vmatprep.mubr.msk.f32.mxu0 %vm1025_vm0, %v1026_v60  ;;  %966 = vmatprep.subr.bf16.mxu1 %v1024_v50  ;;  %v523_v60 = vld [vmem:[%s1525_s5 + $0x28] sm:$0xff]  ;;  %v994_v28 = vpack.c.bf16 %v533_v27, %v532_v26  ;;  %s1000_s5 = scalar_lea.vmem %s619_s20, 128 }
  0x46   :  { %974 = vmatpush3.bf16.msra.mxu0 %v973_v56  ;;  %v979_v61 = vpack.c.bf16 %v523_v60, %v522_v59  ;;  %p1001_p0 = scmp.ne.s32.totalorder %s619_s20, %s1000_s5  ;;  %p1006_p2 = scmp.lt.s32.totalorder %s1000_s5, %s1000_s5 }
  0x47   :  { %975 = vmatprep.subr.bf16.mxu0 %v1024_v50 }
  0x48   :  { %968 = vmatpush3.bf16.msra.mxu1 %v967_v48  ;;  %p1007_p3 = por %p1006_p2, %p1005_p1 }
  0x49   :  { %969 = vmatprep.subr.bf16.mxu1 %v1024_v50 }
  0x4a   :  { %977 = vmatpush3.bf16.msra.mxu0 %v976_v58  ;;  %p1008_p4 = pnand %p1007_p3, %p1001_p0 }
  0x4b   :  { %978 = vmatprep.subr.bf16.mxu0 %v1024_v50 }
  0x4c   :  { %971 = vmatpush3.bf16.msra.mxu1 %v970_v52 }
  0x4e   :  { %980 = vmatpush3.bf16.msra.mxu0 %v979_v61 }
  0x4f   :  { %981 = vmatprep.subr.bf16.mxu0 %v1024_v50 }
  0x52   :  { %983 = vmatpush3.bf16.msra.mxu0 %v982_v0 }
  0x53   :  { %984 = vmatprep.subr.bf16.mxu0 %v1024_v50 }
  0x56   :  { %986 = vmatpush3.bf16.msra.mxu0 %v985_v3 }
  0x57   :  { %987 = vmatprep.subr.bf16.mxu0 %v1024_v50 }
  0x5a   :  { %989 = vmatpush3.bf16.msra.mxu0 %v988_v6 }
  0x5b   :  { %990 = vmatprep.subr.bf16.mxu0 %v1024_v50 }
  0x5e   :  { %992 = vmatpush3.bf16.msra.mxu0 %v991_v9 }
  0x5f   :  { %993 = vmatprep.subr.bf16.mxu0 %v1024_v50 }
  0x62   :  { %995 = vmatpush3.bf16.msra.mxu0 %v994_v28 }
  0xf7   :  { %v662_v10 = vpop.f32.mrb[0].mxu0 }
  0xf8   :  { %v663_v12 = vpop.f32.mrb[1].mxu0 }
  0xf9   :  { %v697_v13 = vpop.f32.mrb[0].mxu1  ;;  %v664_v14 = vadd.f32 %v663_v12, %v662_v10 }
  0xfa   :  { %v698_v15 = vpop.f32.mrb[1].mxu1 }
  0xfb   :  { %v699_v16 = vadd.f32 %v698_v15, %v697_v13  ;;  %v210_v17 = vadd.f32 %v664_v14, %v626_v11 }
  0xfd   :  { %v280_v18 = vadd.f32 %v699_v16, %v210_v17  ;;  %v419_v19 = vpop.f32.mrb[2].mxu1 }
  0xfe   :  { %v778_v20 = vpop.f32.mrb[3].mxu1 }
 0x117   :  { %v732_v21 = vpop.f32.mrb[2].mxu0 }
 0x118   :  { %v733_v22 = vpop.f32.mrb[3].mxu0 }
 0x119   :  { %v734_v23 = vadd.f32 %v733_v22, %v732_v21 }
 0x11b   :  { %v350_v24 = vadd.f32 %v734_v23, %v280_v18 }
 0x11d   :  { %v420_v25 = vadd.f32 %v419_v19, %v350_v24 }
 0x11f   :  { %v423_v50 = vmax.f32 %v420_v25, 0.0 }
 0x121   :  { %812 = vmatmul.mubr.f32.vlgmr.msra.gmra.mrb[4].mxu1 %v423_v50 }
 0x1f4   :  { %v513_v30 = vpop.f32.mrb[4].mxu1 }
 0x1f5   :  { %v514_v31 = vadd.f32 %v628_v29, %v513_v30  ;;  %v813_v32 = vpop.f32.mrb[5].mxu1 }
 0x1f7   :  { %v517_v33 = vmax.f32 %v514_v31, 0.0 }
 0x1f9   :  { %847 = vmatmul.mubr.f32.vlgmr.msra.gmra.mrb[4].mxu0 %v517_v33 }
 0x2cc   :  { %v607_v35 = vpop.f32.mrb[4].mxu0 }
 0x2cd   :  { %v608_v36 = vadd.f32 %v629_v34, %v607_v35  ;;  %v848_v37 = vpop.f32.mrb[5].mxu0 }
 0x2cf   :  { %611 = vst [vmem:[#allocation2] sm:$0xff] %v608_v36 }
 0x2d0   :  { %1011 = shalt.err (!%p1008_p4)
}
 0x2d1   :  { %s1012_s22 = scalar_lea.hbm %s1527_s7, 128 }
 0x2d2   :  { %p1013_p5 = scmp.ne.s32.totalorder %s1527_s7, %s1012_s22  ;;  %p1016_p6 = scmp.lt.u32.totalorder %s1012_s22, %s1527_s7 }
 0x2d4   :  { %p1018_p7 = pnand %p1016_p6, %p1013_p5 }
 0x2d6   :  { %1021 = shalt.err (!%p1018_p7)
}
 0x2d7   :  { %621 = dma.vmem_to_hbm [thread:$0]  %s619_s20, 128, %s1527_s7, [#allocation3]  }
 0x2d8   :  { %1022 = dma.done.wait [#allocation3], 128  }
 0x2d9   :  { %1023 = vsyncadd [#allocation3], 4294967168 }
 0x2da   :  { %625 = vsyncpa [#allocation3], 1 }

</bundles_post_ra>
